<compile_context>
chip_gen: v6e
topology: v6e:2x2x1
jax: 0.10.0
libtpu: 0.0.40
codegen_flags: <defaults>
</compile_context>

<pallas_src>
import functools

import jax
import jax.numpy as jnp
from jax.experimental import pallas as pl
from jax.experimental.pallas import tpu as pltpu


def _layernorm2d_kernel(x_ref, w_ref, b_ref, o_ref, *, eps):
    # x_ref: (Bn, C, T)  channels on sublanes, lane-dense spatial tile last
    # w_ref: (C, 1)      affine scale
    # b_ref: (C, 1)      affine shift
    # o_ref: (Bn, C, T)
    x = x_ref[...].astype(jnp.float32)                   # (Bn, C, T)
    mu = jnp.mean(x, axis=1, keepdims=True)              # (Bn, 1, T)  XLU sublane reduce
    xc = x - mu
    var = jnp.mean(xc * xc, axis=1, keepdims=True)       # biased variance
    inv = jax.lax.rsqrt(var + eps)                       # EUP
    w = w_ref[...].astype(jnp.float32)[None]              # (1, C, 1)
    b = b_ref[...].astype(jnp.float32)[None]
    o_ref[...] = (w * (xc * inv) + b).astype(o_ref.dtype)


def _choose_tiling(N, C, HW, itemsize, target_block_bytes=2 * 1024 * 1024):
    """Pick (Bn, t, n_spatial, hw_pad) from a per-block byte budget."""
    # Spatial extent padded to a lane multiple (128).
    hw128 = ((HW + 127) // 128) * 128

    # Largest multiple-of-128 spatial tile whose (1, C, t) block fits the budget.
    bytes_per_col = C * itemsize
    t = max(128, (target_block_bytes // max(bytes_per_col, 1)) // 128 * 128)
    t = min(t, hw128)
    hw_pad = ((hw128 + t - 1) // t) * t
    n_spatial = hw_pad // t

    # Batch blocking: amortize per-step overhead when one image's (C, HW) slab
    # is far below the budget.  Never drop below 2 total grid steps if the
    # original problem had >= 2 (keeps both v7x TensorCores busy).
    bn = 1
    if n_spatial == 1 and N > 1:
        block_bytes = C * t * itemsize
        min_total = 2 if N * n_spatial >= 2 else 1
        for d in range(N, 0, -1):
            if N % d != 0:
                continue
            if d * block_bytes > target_block_bytes:
                continue
            if (N // d) * n_spatial < min_total:
                continue
            bn = d
            break

    # v7x megacore: if everything collapsed to a single grid step but the
    # spatial extent can be split, split it in two so both TCs get work.
    if (N // bn) * n_spatial == 1 and hw_pad >= 256:
        t = ((hw_pad // 2 + 127) // 128) * 128
        hw_pad = 2 * t
        n_spatial = 2

    return bn, t, n_spatial, hw_pad


def layer_norm_2d_forward(x, weight, bias, eps=1e-6):
    """LayerNorm2d forward.

    x:      (N, C, H, W)   NCHW, same layout/dtype as the PyTorch module input
    weight: (C,)
    bias:   (C,)
    returns (N, C, H, W)
    """
    N, C, H, W = x.shape
    HW = H * W
    itemsize = jnp.dtype(x.dtype).itemsize

    bn, t, n_spatial, hw_pad = _choose_tiling(N, C, HW, itemsize)

    # Collapse spatial onto the lane axis; pad to a tile multiple if needed.
    x_r = x.reshape(N, C, HW)
    if hw_pad > HW:
        x_r = jnp.pad(x_r, ((0, 0), (0, 0), (0, hw_pad - HW)))
    w_2d = weight.reshape(C, 1)
    b_2d = bias.reshape(C, 1)

    cost = pl.CostEstimate(
        flops=int(7 * N * C * HW),
        transcendentals=int(N * HW),
        bytes_accessed=int(2 * N * C * HW * itemsize
                           + 2 * C * jnp.dtype(weight.dtype).itemsize),
    )

    out_r = pl.pallas_call(
        functools.partial(_layernorm2d_kernel, eps=float(eps)),
        out_shape=jax.ShapeDtypeStruct((N, C, hw_pad), x.dtype),
        grid_spec=pltpu.PrefetchScalarGridSpec(
            num_scalar_prefetch=0,
            grid=(N // bn, n_spatial),
            in_specs=[
                pl.BlockSpec((bn, C, t), lambda i, j: (i, 0, j)),
                pl.BlockSpec((C, 1), lambda i, j: (0, 0)),
                pl.BlockSpec((C, 1), lambda i, j: (0, 0)),
            ],
            out_specs=pl.BlockSpec((bn, C, t), lambda i, j: (i, 0, j)),
        ),
        compiler_params=pltpu.CompilerParams(
            dimension_semantics=("parallel", "parallel"),
            vmem_limit_bytes=32 * 1024 * 1024,
        ),
        cost_estimate=cost,
    )(x_r, w_2d, b_2d)

    if hw_pad > HW:
        out_r = out_r[:, :, :HW]
    return out_r.reshape(N, C, H, W)


if __name__ == "__main__":
    # LayerNorm2d(channels=4), small shapes: batch=2, channels=4, spatial=16x16
    N, C, H, W = 2, 4, 16, 16
    eps = 1e-6

    key = jax.random.PRNGKey(0)
    kx, kw, kb = jax.random.split(key, 3)
    x = jax.random.normal(kx, (N, C, H, W), dtype=jnp.float32)
    # Module initializes weight=ones, bias=zeros; perturb to exercise the affine.
    weight = 1.0 + 0.1 * jax.random.normal(kw, (C,), dtype=jnp.float32)
    bias = 0.1 * jax.random.normal(kb, (C,), dtype=jnp.float32)

    out = layer_norm_2d_forward(x, weight, bias, eps)
    out = jax.block_until_ready(out)

    # Pure-JAX reference (mirrors LayerNormFunction.forward exactly).
    mu = x.mean(axis=1, keepdims=True)
    var = ((x - mu) ** 2).mean(axis=1, keepdims=True)
    y = (x - mu) / jnp.sqrt(var + eps)
    ref = weight.reshape(1, C, 1, 1) * y + bias.reshape(1, C, 1, 1)

    assert out.shape == (N, C, H, W)
    assert jnp.allclose(out, ref, atol=1e-5, rtol=1e-5)

    print("KERNEL_OK")
</pallas_src>

<mosaic_0001>
module attributes {stable_mosaic.version = 11 : i64} {
  func.func @_layernorm2d_kernel(%arg0: i32, %arg1: i32, %arg2: memref<1x4x256xf32, #tpu.memory_space<vmem>>, %arg3: memref<4x1xf32, #tpu.memory_space<vmem>>, %arg4: memref<4x1xf32, #tpu.memory_space<vmem>>, %arg5: memref<1x4x256xf32, #tpu.memory_space<vmem>>) attributes {dimension_semantics = [#tpu.dimension_semantics<parallel>, #tpu.dimension_semantics<parallel>], iteration_bounds = array<i64: 2, 1>, scalar_prefetch = 0 : i64, scratch_operands = 0 : i64, tpu.core_type = #tpu.core_type<tc>, window_params = [{transform_indices = @transform_0, window_bounds = array<i64: 1, 4, 256>}, {pipeline_mode = #tpu.pipeline_mode<synchronous>, transform_indices = @transform_1, window_bounds = array<i64: 4, 1>}, {pipeline_mode = #tpu.pipeline_mode<synchronous>, transform_indices = @transform_2, window_bounds = array<i64: 4, 1>}, {transform_indices = @transform_3, window_bounds = array<i64: 1, 4, 256>}]} {
    %c0 = arith.constant 0 : index
    %c0_0 = arith.constant 0 : index
    %c0_1 = arith.constant 0 : index
    %0 = vector.load %arg2[%c0, %c0_0, %c0_1] : memref<1x4x256xf32, #tpu.memory_space<vmem>>, vector<1x4x256xf32>
    %cst = arith.constant dense<0.000000e+00> : vector<1x256xf32>
    %1 = vector.multi_reduction <add>, %0, %cst [1] : vector<1x4x256xf32> to vector<1x256xf32>
    %2 = vector.shape_cast %1 : vector<1x256xf32> to vector<1x1x256xf32>
    %cst_2 = arith.constant 4.000000e+00 : f32
    %3 = vector.broadcast %cst_2 : f32 to vector<1x1x256xf32>
    %4 = arith.divf %2, %3 : vector<1x1x256xf32>
    %5 = vector.broadcast %4 : vector<1x1x256xf32> to vector<1x4x256xf32>
    %6 = arith.subf %0, %5 : vector<1x4x256xf32>
    %7 = arith.mulf %6, %6 : vector<1x4x256xf32>
    %cst_3 = arith.constant dense<0.000000e+00> : vector<1x256xf32>
    %8 = vector.multi_reduction <add>, %7, %cst_3 [1] : vector<1x4x256xf32> to vector<1x256xf32>
    %9 = vector.shape_cast %8 : vector<1x256xf32> to vector<1x1x256xf32>
    %cst_4 = arith.constant 4.000000e+00 : f32
    %10 = vector.broadcast %cst_4 : f32 to vector<1x1x256xf32>
    %11 = arith.divf %9, %10 : vector<1x1x256xf32>
    %cst_5 = arith.constant 9.99999997E-7 : f32
    %12 = vector.broadcast %cst_5 : f32 to vector<1x1x256xf32>
    %13 = arith.addf %11, %12 : vector<1x1x256xf32>
    %14 = math.rsqrt %13 : vector<1x1x256xf32>
    %c0_6 = arith.constant 0 : index
    %c0_7 = arith.constant 0 : index
    %15 = vector.load %arg3[%c0_6, %c0_7] : memref<4x1xf32, #tpu.memory_space<vmem>>, vector<4x1xf32>
    %16 = vector.shape_cast %15 : vector<4x1xf32> to vector<1x4x1xf32>
    %c0_8 = arith.constant 0 : index
    %c0_9 = arith.constant 0 : index
    %17 = vector.load %arg4[%c0_8, %c0_9] : memref<4x1xf32, #tpu.memory_space<vmem>>, vector<4x1xf32>
    %18 = vector.shape_cast %17 : vector<4x1xf32> to vector<1x4x1xf32>
    %19 = vector.broadcast %14 : vector<1x1x256xf32> to vector<1x4x256xf32>
    %20 = arith.mulf %6, %19 : vector<1x4x256xf32>
    %21 = vector.broadcast %16 : vector<1x4x1xf32> to vector<1x4x256xf32>
    %22 = arith.mulf %21, %20 : vector<1x4x256xf32>
    %23 = vector.broadcast %18 : vector<1x4x1xf32> to vector<1x4x256xf32>
    %24 = arith.addf %22, %23 : vector<1x4x256xf32>
    %c0_10 = arith.constant 0 : index
    %c0_11 = arith.constant 0 : index
    %c0_12 = arith.constant 0 : index
    %25 = vector.load %arg5[%c0_10, %c0_11, %c0_12] : memref<1x4x256xf32, #tpu.memory_space<vmem>>, vector<1x4x256xf32>
    tpu.vector_store %arg5[%c0_10, %c0_11, %c0_12], %24 {strides = array<i32>} : memref<1x4x256xf32, #tpu.memory_space<vmem>>, vector<1x4x256xf32>,
    return
  }
  func.func @transform_0(%arg0: i32, %arg1: i32) -> (i32, i32, i32) {
    %c0_i32 = arith.constant 0 : i32
    %c0_i32_0 = arith.constant 0 : i32
    return %arg0, %c0_i32, %arg1 : i32, i32, i32
  }
  func.func @transform_1(%arg0: i32, %arg1: i32) -> (i32, i32) {
    %c0_i32 = arith.constant 0 : i32
    %c0_i32_0 = arith.constant 0 : i32
    %c0_i32_1 = arith.constant 0 : i32
    return %c0_i32, %c0_i32_0 : i32, i32
  }
  func.func @transform_2(%arg0: i32, %arg1: i32) -> (i32, i32) {
    %c0_i32 = arith.constant 0 : i32
    %c0_i32_0 = arith.constant 0 : i32
    %c0_i32_1 = arith.constant 0 : i32
    return %c0_i32, %c0_i32_0 : i32, i32
  }
  func.func @transform_3(%arg0: i32, %arg1: i32) -> (i32, i32, i32) {
    %c0_i32 = arith.constant 0 : i32
    %c0_i32_0 = arith.constant 0 : i32
    return %arg0, %c0_i32, %arg1 : i32, i32, i32
  }
}

</mosaic_0001>

<bundles_post_ra>
// kernel: tpu_custom_call.1
= control target key start
LH: loop header
LB: loop body
LE: loop exit
PB: predicated region body
PF: predicated region fallthrough
CT: control target
= control target key end

     0   :  { %8 = vsyncpa [#allocation3], 0  ;;  %s755_s0 = inlined_call_operand.hbm [shape: f32[2,4,256], index: 0, kind: input, shape index: {}]   ;;  %s756_s1 = inlined_call_operand.vmem [shape: f32[4,1], index: 1, kind: input, shape index: {}]   ;;  %s757_s2 = inlined_call_operand.vmem [shape: f32[4,1], index: 2, kind: input, shape index: {}]   ;;  %s758_s3 = inlined_call_operand.hbm [shape: f32[2,4,256], index: 3, kind: output, shape index: {}]  }
   0x1   :  { %10 = vsyncpa [#allocation3 + $0x1], 0 }
   0x2   :  { %11 = vsyncpa [#allocation4], 0 }
   0x3   :  { %13 = vsyncpa [#allocation4 + $0x1], 0  ;;  %s607_s12 = smov 0   ;;  %s609_s13 = smov 0  }
   0x4   :  { %s611_s14 = smov 0   ;;  %s613_s15 = smov 0  }
   0x5   :  { %s615_s16 = smov 0   ;;  %s617_s17 = smov 0  }
   0x6 LB: > { %s388_s18 = sadd.s32 4294967295, %s582_s17   ;;  %s389_s19 = sadd.s32 4294967294, %s582_s17   ;;  %s582_s17 = sphi %s617_s17, %s19_s17   ;;  %s578_s16 = sphi %s615_s16, %s770_s16   ;;  %s574_s15 = sphi %s613_s15, %s769_s15   ;;  %s570_s14 = sphi %s611_s14, %s768_s14   ;;  %s566_s13 = sphi %s609_s13, %s767_s13   ;;  %s562_s12 = sphi %s607_s12, %s766_s12  }
   0x7   : > { %s31_s20 = sadd.s32 1, %s578_s16  ;;  %s40_s21 = sadd.s32 1, %s570_s14 }
   0x8   : > { %p33_p0 = scmp.ge.s32.totalorder %s31_s20, 2  ;;  %p47_p1 = scmp.ne.s32.totalorder %s570_s14, %s566_s13 }
   0x9   : > { %p48_p2 = scmp.eq.s32.totalorder %s582_s17, 0  ;;  %p53_p3 = scmp.ne.s32.totalorder %s566_s13, %s562_s12 }
   0xa   : > { %s772_s20 = smov (%p33_p0, %s31_s20), 0  ;;  %p54_p5 = scmp.eq.s32.totalorder %s388_s18, 0 }
   0xb   : > { %p648_p4 = por %p48_p2, %p47_p1  ;;  %s35_s23 = ssub.s32 %s578_s16, %s772_s20 }
   0xc   : > { %p121_p6 = scmp.eq.s32.totalorder %s388_s18, 1  ;;  %p38_p7 = scmp.eq.s32.totalorder %s35_s23, 0 }
   0xd   : > { %p654_p8 = por %p54_p5, %p53_p3  ;;  %p127_p10 = scmp.eq.s32.totalorder %s389_s19, 1 }
   0xe   : > { %p658_p9 = por %p121_p6, %p47_p1  ;;  %p417_p13 = scmp.lt.s32.totalorder %s582_s17, 2 }
   0xf   : > { %s663_s26 = scalar_select %p38_p7, %s570_s14, %s40_s21  }
  0x10   : > { %p665_p11 = por %p127_p10, %p53_p3  ;;  %s153_s28 = sand.u32 1, %s570_s14  }
  0x11   : > { %s392_s29 = sshll.u32 %s153_s28, 3  ;;  %s403_s30 = sshll.u32 %s578_s16, 7 }
  0x12   : > { %s762_s27 = scalar_select %p665_p11, 1, 0 }
  0x13   : > { %s165_s6 = scalar_lea.hbm %s755_s0, %s403_s30  ;;  %s157_s7 = scalar_lea.vmem [#allocation2], %s392_s29 }
  0x14   : > { %s167_s8 = sshll.u32 %s157_s7, 4  ;;  %p678_p0 = pnand %p417_p13, %p648_p4  ;;  %s168_s8 = int_to_ptr.vmem [resolvable:$true] %s167_s8 }
  0x15   : > { %p395_p1 = scmp.ge.s32.totalorder %s582_s17, 1  ;;  %p172_p2 = scmp.lt.s32.totalorder %s582_s17, 3 }
  0x16   : > { %s154_s10 = scalar_lea.sflag [#allocation3], %s153_s28  ;;  %p476_p3 = pneg %p678_p0 }
  0x17   : > { %s487_s11 = scalar_lea.vmem %s168_s8, 128  ;;  %s584_s18 = smov [#allocation2]  }
  0x18   : > { %p488_p5 = scmp.ne.s32.totalorder %s168_s8, %s487_s11  ;;  %s492_s19 = sshll.u32 %s584_s18, 4  ;;  %s493_s19 = int_to_ptr.vmem [resolvable:$false] %s492_s19 }
  0x19   : > { %s494_s21 = scalar_lea.vmem %s493_s19, 256  ;;  %p495_p10 = scmp.lt.s32.totalorder %s168_s8, %s493_s19 }
  0x1a   : > { %p490_p6 = pnand %p488_p5, %p476_p3  ;;  %p496_p12 = scmp.lt.s32.totalorder %s494_s21, %s487_s11 }
  0x1c   : > { %p491_p7 = pneg %p490_p6  ;;  %p497_p4 = por %p496_p12, %p495_p10 }
  0x1e   : > { %p498_p13 = pnand %p497_p4, %p491_p7 }
  0x20   : > { %501 = shalt.err (!%p498_p13)
}
  0x21   : > { %412 = dma.hbm_to_vmem [thread:$0]  (!%p678_p0), %s165_s6, 128, %s168_s8, %s154_s10  }
  0x22   : > { %p173_p11 = pnand %p395_p1, %p172_p2 }
  0x23   : > { %s693_s22 = sand.u32 (!%p173_p11), 1, %s566_s13  }
  0x24   : > { %176 = sbr.rel (%p173_p11) target bundleno = 189 (0xbd), region = 32  ;;  %s396_s23 = sshll.u32 (!%p173_p11), %s693_s22, 3 }
  0x25   : > { %s179_s28 = scalar_lea.sflag (!%p173_p11), [#allocation3], %s693_s22  ;;  %s182_s29 = scalar_lea.vmem (!%p173_p11), [#allocation2], %s396_s23 }
  0x29   : > { %553 = dma.done.wait (%p654_p8), %s179_s28, 128  }
  0x2a   : > { %555 = vsyncadd (%p654_p8), %s179_s28, 4294967168  ;;  %v585_v0 = vmov 0   ;;  %v258_v1 = vld [vmem:[%s756_s1] sm:$0xf]  ;;  %vm211_vm0 = vcmask 1043456   ;;  %s404_s24 = sshll.u32 %s574_s15, 7 }
  0x2b   : > { %468 = vset.pattern.permute.xlu0 %v585_v0  ;;  %v259_v2 = vld [vmem:[%s757_s2] sm:$0xf]  ;;  %s204_s7 = scalar_lea.vmem [#allocation5], %s396_s23  ;;  %s302_s11 = scalar_lea.hbm %s758_s3, %s404_s24 }
  0x2c   : > { %267 = vperm.xlu0 %468, %v258_v1   ;;  %v207_v3 = vld [vmem:[%s182_s29] sm:$0xff]  ;;  %s304_s8 = sshll.u32 %s204_s7, 4  ;;  %s288_s18 = scalar_lea.sflag [#allocation4], %s693_s22  ;;  %s305_s8 = int_to_ptr.vmem [resolvable:$true] %s304_s8 }
  0x2d   : > { %v209_v4 = vcombine.high %v207_v3, %v207_v3  ;;  %v212_v5 = vsel %vm211_vm0, %v207_v3, 0.0  ;;  %s502_s19 = scalar_lea.vmem %s305_s8, 128  ;;  %s586_s21 = smov [#allocation5]  }
  0x2e   : > { %v213_v7 = vrot.slane %v212_v5, 4  ;;  %p503_p8 = scmp.ne.s32.totalorder %s305_s8, %s502_s19  ;;  %s506_s15 = sshll.u32 %s586_s21, 4  ;;  %s507_s15 = int_to_ptr.vmem [resolvable:$false] %s506_s15 }
  0x2f   : > { %v219_v6 = vsel %vm211_vm0, %v209_v4, 0.0  ;;  %s508_s23 = scalar_lea.vmem %s507_s15, 256  ;;  %p509_p0 = scmp.lt.s32.totalorder %s305_s8, %s507_s15 }
  0x30   : > { %277 = vperm.xlu0 %468, %v259_v2   ;;  %v220_v8 = vrot.slane %v219_v6, 4  ;;  %v214_v9 = vadd.f32 %v213_v7, %v212_v5  ;;  %p504_p11 = pnand %p503_p8, %p658_p9  ;;  %p510_p1 = scmp.lt.s32.totalorder %s508_s23, %s502_s19 }
  0x32   : > { %v221_v10 = vadd.f32 %v220_v8, %v219_v6  ;;  %v215_v11 = vrot.slane %v214_v9, 2  ;;  %p505_p12 = pneg %p504_p11  ;;  %p511_p2 = por %p510_p1, %p509_p0 }
  0x34   : > { %v222_v12 = vrot.slane %v221_v10, 2  ;;  %v216_v13 = vadd.f32 %v215_v11, %v214_v9  ;;  %p512_p3 = pnand %p511_p2, %p505_p12 }
  0x36   : > { %v223_v14 = vadd.f32 %v222_v12, %v221_v10  ;;  %v217_v15 = vrot.slane %v216_v13, 1 }
  0x38   : > { %v224_v16 = vrot.slane %v223_v14, 1  ;;  %v218_v17 = vadd.f32 %v217_v15, %v216_v13 }
  0x3a   : > { %v225_v18 = vadd.f32 %v224_v16, %v223_v14  ;;  %v227_v19 = vmul.f32 0.25, %v218_v17 }
  0x3c   : > { %v228_v20 = vmul.f32 0.25, %v225_v18 }
  0x3e   : > { %v231_v21 = vcombine.low %v227_v19, %v228_v20 }
  0x40   : > { %v233_v22 = vsub.f32 %v207_v3, %v231_v21 }
  0x42   : > { %v234_v23 = vmul.f32 %v233_v22, %v233_v22 }
  0x44   : > { %v236_v24 = vcombine.high %v234_v23, %v234_v23  ;;  %v238_v25 = vsel %vm211_vm0, %v234_v23, 0.0 }
  0x45   : > { %v239_v27 = vrot.slane %v238_v25, 4 }
  0x46   : > { %v245_v26 = vsel %vm211_vm0, %v236_v24, 0.0 }
  0x47   : > { %v246_v28 = vrot.slane %v245_v26, 4  ;;  %v240_v29 = vadd.f32 %v239_v27, %v238_v25 }
  0x49   : > { %v247_v30 = vadd.f32 %v246_v28, %v245_v26  ;;  %v241_v31 = vrot.slane %v240_v29, 2 }
  0x4b   : > { %v248_v32 = vrot.slane %v247_v30, 2  ;;  %v242_v33 = vadd.f32 %v241_v31, %v240_v29 }
  0x4d   : > { %v249_v34 = vadd.f32 %v248_v32, %v247_v30  ;;  %v243_v35 = vrot.slane %v242_v33, 1 }
  0x4f   : > { %v250_v36 = vrot.slane %v249_v34, 1  ;;  %v244_v37 = vadd.f32 %v243_v35, %v242_v33 }
  0x51   : > { %v251_v38 = vadd.f32 %v250_v36, %v249_v34  ;;  %v252_v39 = vmul.f32 0.25, %v244_v37 }
  0x53   : > { %v253_v40 = vmul.f32 0.25, %v251_v38  ;;  %v254_v41 = vadd.f32 1e-06, %v252_v39 }
  0x55   : > { %v255_v42 = vadd.f32 1e-06, %v253_v40  ;;  %470 = vrsqrt.f32 %v254_v41 }
  0x57   : > { %472 = vrsqrt.f32 %v255_v42 }
  0x62   : > { %v471_v43 = vpop.eup %470 }
  0x64   : > { %v473_v44 = vpop.eup %472 }
  0x65   : > { %v262_v45 = vcombine.low %v471_v43, %v473_v44 }
  0x67   : > { %v264_v46 = vmul.f32 %v262_v45, %v233_v22 }
  0x69   : > { %v271_v47 = vcombine.high %v264_v46, %v264_v46 }
  0xa7   : > { %v268_v48 = vpop.permute.xlu0 %267 }
  0xa8   : > { %v273_v49 = vmul.f32 %v268_v48, %v264_v46  ;;  %v274_v50 = vmul.f32 %v271_v47, %v268_v48 }
  0xab   : > { %v278_v51 = vpop.permute.xlu0 %277 }
  0xac   : > { %v280_v52 = vadd.f32 %v278_v51, %v273_v49  ;;  %v281_v53 = vadd.f32 %v278_v51, %v274_v50 }
  0xae   : > { %v284_v54 = vcombine.low %v280_v52, %v281_v53 }
  0xb0   : > { %286 = vst [vmem:[%s204_s7] sm:$0xff] %v284_v54 }
  0xb1   : > { %515 = shalt.err (!%p512_p3)
}
  0xb2   : > { %s516_s28 = scalar_lea.hbm %s302_s11, 128  ;;  %s520_s30 = scalar_lea.hbm %s758_s3, 256 }
  0xb3   : > { %p517_p5 = scmp.ne.s32.totalorder %s302_s11, %s516_s28  ;;  %p521_p10 = scmp.lt.s32.totalorder %s302_s11, %s758_s3 }
  0xb4   : > { %p522_p4 = scmp.lt.s32.totalorder %s520_s30, %s516_s28 }
  0xb5   : > { %p518_p6 = pnand %p517_p5, %p658_p9 }
  0xb6   : > { %p523_p13 = por %p522_p4, %p521_p10 }
  0xb7   : > { %p519_p7 = pneg %p518_p6 }
  0xb9   : > { %p524_p8 = pnand %p523_p13, %p519_p7 }
  0xbb   : > { %527 = shalt.err (!%p524_p8)
}
  0xbc   : > { %407 = dma.vmem_to_hbm [thread:$0]  (%p658_p9), %s305_s8, 128, %s302_s11, %s288_s18  }
  0xbd PF: > { %s316_s6 = sand.u32 1, %s562_s12   ;;  %p764_p11 = scmp.ne.s32.totalorder %s762_s27, 0 }
  0xbe   : > { %p765_p12 = scmp.ge.s32.totalorder %s582_s17, 2  ;;  %s317_s24 = scalar_lea.sflag [#allocation4], %s316_s6 }
  0xc0   : > { %p414_p0 = pnand %p765_p12, %p764_p11 }
  0xc2   : > { %p415_p1 = pneg %p414_p0 }
  0xc4   : > { %557 = dma.done.wait (%p415_p1), %s317_s24, 128  }
  0xc5   : > { %559 = vsyncadd (%p415_p1), %s317_s24, 4294967168  ;;  %s19_s17 = sadd.s32 1, %s582_s17   ;;  %s766_s12 = smov %s566_s13 }
  0xc6   : > { %p16_p2 = scmp.ge.s32.totalorder %s19_s17, 4   ;;  %s767_s13 = smov %s570_s14 }
  0xc7   : > { %s768_s14 = smov %s663_s26  ;;  %s769_s15 = smov %s578_s16 }
  0xc8   : > { %s770_s16 = smov %s772_s20  ;;  %18 = sbr.rel (!%p16_p2) target bundleno = 6 (0x6), region = 77 }
  0xcd   :  { %322 = vsyncpa [#allocation3], 1 }
  0xce   :  { %324 = vsyncpa [#allocation3 + $0x1], 1 }
  0xcf   :  { %325 = vsyncpa [#allocation4], 1 }
  0xd0   :  { %327 = vsyncpa [#allocation4 + $0x1], 1 }

</bundles_post_ra>
